<compile_context>
chip_gen: v5e
topology: v5e:2x2
jax: 0.10.0
libtpu: 0.0.40
codegen_flags: <defaults>
</compile_context>

<pallas_src>
import functools

import jax
import jax.numpy as jnp
from jax.experimental import pallas as pl
from jax.experimental.pallas import tpu as pltpu

_LANE = 128       # vreg lane width (last dim)
_SUBLANE = 8      # vreg sublane width (second-to-last dim)
_DEFAULT_BATCH_TILE = 2048   # safe on v5e/v6e/v7x scoped-VMEM defaults


def _round_up(v: int, m: int) -> int:
    return (v + m - 1) // m * m


# ----------------------------------------------------------------------------
# Kernel: whole MLP for one batch tile.  Weights/biases are grid-invariant
# whole-array VMEM blocks; only the batch tile of x and the output move per
# grid step.
# ----------------------------------------------------------------------------
def _mlp_kernel(x_ref, *refs, n_layers: int, compute_dtype):
    """refs = (w0, b0, w1, b1, ..., w_{L-1}, b_{L-1}, o_ref)."""
    h = x_ref[...].astype(jnp.float32)           # (TB, in_dim) f32
    idx = 0
    for layer in range(n_layers):
        w = refs[idx][...]                        # stored in compute_dtype
        b = refs[idx + 1][...].astype(jnp.float32)
        idx += 2
        h = jnp.dot(h.astype(compute_dtype), w,
                    preferred_element_type=jnp.float32) + b
        if layer != n_layers - 1:
            h = jnp.maximum(h, 0.0)               # ReLU on f32 accumulator
    o_ref = refs[idx]
    o_ref[...] = h.astype(o_ref.dtype)            # (TB, n_out) store


# ----------------------------------------------------------------------------
# Parameter init (matches nn.Linear shapes; W stored as (d_in, d_out)).
# ----------------------------------------------------------------------------
def init_simple_classifier(key, input_dim, n_output_nodes, hidden_dims=None):
    dims = [input_dim] + (list(hidden_dims) if hidden_dims else []) + [n_output_nodes]
    params = []
    for i in range(len(dims) - 1):
        d_in, d_out = dims[i], dims[i + 1]
        key, kw, kb = jax.random.split(key, 3)
        bound = 1.0 / jnp.sqrt(jnp.float32(d_in))
        w = jax.random.uniform(kw, (d_in, d_out), jnp.float32, -bound, bound)
        b = jax.random.uniform(kb, (d_out,), jnp.float32, -bound, bound)
        params.append((w, b))
    return params


# ----------------------------------------------------------------------------
# One-time (init-time) preparation: pad hidden widths to 128 lanes (exact
# zero padding), keep the final output width unpadded, cast weights to the
# MXU compute dtype.  Done ONCE, never inside the forward path.
# ----------------------------------------------------------------------------
def prepare_classifier_params(params, compute_dtype=jnp.bfloat16):
    n_layers = len(params)
    ops = []
    prev_pad = params[0][0].shape[0]              # layer-0 input dim (unpadded)
    for i, (w, b) in enumerate(params):
        d_in, d_out = w.shape
        in_pad = prev_pad
        last = (i == n_layers - 1)
        out_pad = d_out if last else _round_up(d_out, _LANE)
        wp = jnp.zeros((in_pad, out_pad), compute_dtype)
        wp = wp.at[:d_in, :d_out].set(w.astype(compute_dtype))
        bp = jnp.zeros((1, out_pad), jnp.float32)
        bp = bp.at[:, :d_out].set(b.astype(jnp.float32))
        ops += [wp, bp]
        prev_pad = out_pad
    meta = dict(n_layers=n_layers,
                in_dim=params[0][0].shape[0],
                n_out=params[-1][0].shape[1],
                compute_dtype=compute_dtype)
    return tuple(ops), meta


# ----------------------------------------------------------------------------
# Forward pass (mirrors SimpleClassifier.forward): returns outputs + latents.
# ----------------------------------------------------------------------------
def simple_classifier_forward(prepared_ops, meta, x, extra_features=None,
                              batch_tile=_DEFAULT_BATCH_TILE):
    has_extra = extra_features is not None
    latents = jnp.concatenate([x, extra_features], axis=1) if has_extra else x

    xin = latents.astype(jnp.float32)             # torch `.float()`
    batch, in_dim = xin.shape
    assert in_dim == meta["in_dim"]
    n_layers = meta["n_layers"]
    n_out = meta["n_out"]

    # Batch tile: one sublane-aligned block for small batches, fixed tile +
    # zero-pad only when the batch doesn't divide evenly.
    if batch <= batch_tile:
        tb = _round_up(batch, _SUBLANE)
    else:
        tb = _round_up(batch_tile, _SUBLANE)
    batch_pad = _round_up(batch, tb)
    if batch_pad != batch:
        xin = jnp.pad(xin, ((0, batch_pad - batch), (0, 0)))
    grid = (batch_pad // tb,)

    in_specs = [pl.BlockSpec((tb, in_dim), lambda i: (i, 0))]
    for op in prepared_ops:                       # grid-invariant weights/biases
        in_specs.append(pl.BlockSpec(op.shape, lambda i: (0, 0)))
    out_specs = pl.BlockSpec((tb, n_out), lambda i: (i, 0))

    kernel = functools.partial(_mlp_kernel, n_layers=n_layers,
                               compute_dtype=meta["compute_dtype"])
    out = pl.pallas_call(
        kernel,
        grid=grid,
        out_shape=jax.ShapeDtypeStruct((batch_pad, n_out), jnp.float32),
        in_specs=in_specs,
        out_specs=out_specs,
        compiler_params=pltpu.CompilerParams(
            dimension_semantics=("parallel",)),   # 2 TCs on v7x; no-op v5e/v6e
    )(xin, *prepared_ops)

    if batch_pad != batch:
        out = out[:batch]
    return {"outputs": out, "latents": latents}


# ----------------------------------------------------------------------------
# Pure-JAX reference (f32 everywhere).
# ----------------------------------------------------------------------------
def _reference_forward(params, x, extra_features=None):
    if extra_features is not None:
        x = jnp.concatenate([x, extra_features], axis=1)
    h = x.astype(jnp.float32)
    for i, (w, b) in enumerate(params):
        h = h @ w + b
        if i != len(params) - 1:
            h = jnp.maximum(h, 0.0)
    return h


if __name__ == "__main__":
    key = jax.random.PRNGKey(0)
    k_x, k_extra, k_p1, k_p2, k_xl, k_el = jax.random.split(key, 6)

    main_dim, extra_dim = 24, 8
    input_dim = main_dim + extra_dim              # after concat
    hidden_dims = [64, 32]
    n_out = 8

    params = init_simple_classifier(k_p1, input_dim, n_out, hidden_dims)

    # Tolerance covers both f32-on-MXU (default-precision passes) and bf16
    # compute with f32 accumulation; semantic errors would be O(1).
    TOL = dict(atol=5e-2, rtol=5e-2)

    # --- Case 1: small batch, hidden layers + extra_features, f32 compute ---
    batch = 8
    x = jax.random.normal(k_x, (batch, main_dim), jnp.float32)
    extra = jax.random.normal(k_extra, (batch, extra_dim), jnp.float32)
    ops_f32, meta_f32 = prepare_classifier_params(params, compute_dtype=jnp.float32)
    out1 = simple_classifier_forward(ops_f32, meta_f32, x, extra_features=extra)
    jax.block_until_ready(out1["outputs"])
    ref1 = _reference_forward(params, x, extra_features=extra)
    assert out1["outputs"].shape == (batch, n_out)
    assert out1["latents"].shape == (batch, input_dim)
    assert jnp.allclose(out1["outputs"], ref1, **TOL)

    # --- Case 2: larger ragged batch exercising the tiled grid, bf16 MXU ----
    big_batch = 300                                # 3 grid steps @ tile 128
    xl = jax.random.normal(k_xl, (big_batch, main_dim), jnp.float32)
    el = jax.random.normal(k_el, (big_batch, extra_dim), jnp.float32)
    ops_bf16, meta_bf16 = prepare_classifier_params(params, compute_dtype=jnp.bfloat16)
    out2 = simple_classifier_forward(ops_bf16, meta_bf16, xl, extra_features=el,
                                     batch_tile=128)
    jax.block_until_ready(out2["outputs"])
    ref2 = _reference_forward(params, xl, extra_features=el)
    assert out2["outputs"].shape == (big_batch, n_out)
    assert out2["latents"].shape == (big_batch, input_dim)
    assert jnp.allclose(out2["outputs"], ref2, **TOL)

    # --- Case 3: no hidden layers, no extra_features ------------------------
    params2 = init_simple_classifier(k_p2, main_dim, n_out, None)
    ops3, meta3 = prepare_classifier_params(params2, compute_dtype=jnp.float32)
    out3 = simple_classifier_forward(ops3, meta3, x, extra_features=None)
    jax.block_until_ready(out3["outputs"])
    ref3 = _reference_forward(params2, x, extra_features=None)
    assert out3["outputs"].shape == (batch, n_out)
    assert out3["latents"].shape == (batch, main_dim)
    assert jnp.allclose(out3["outputs"], ref3, **TOL)

    print("KERNEL_OK")
</pallas_src>

<mosaic_0001>
module attributes {stable_mosaic.version = 11 : i64} {
  func.func @_mlp_kernel(%arg0: i32, %arg1: memref<8x32xf32, #tpu.memory_space<vmem>>, %arg2: memref<32x128xf32, #tpu.memory_space<vmem>>, %arg3: memref<1x128xf32, #tpu.memory_space<vmem>>, %arg4: memref<128x128xf32, #tpu.memory_space<vmem>>, %arg5: memref<1x128xf32, #tpu.memory_space<vmem>>, %arg6: memref<128x8xf32, #tpu.memory_space<vmem>>, %arg7: memref<1x8xf32, #tpu.memory_space<vmem>>, %arg8: memref<8x8xf32, #tpu.memory_space<vmem>>) attributes {dimension_semantics = [#tpu.dimension_semantics<parallel>], iteration_bounds = array<i64: 1>, scalar_prefetch = 0 : i64, scratch_operands = 0 : i64, tpu.core_type = #tpu.core_type<tc>, window_params = [{transform_indices = @transform_0, window_bounds = array<i64: 8, 32>}, {pipeline_mode = #tpu.pipeline_mode<synchronous>, transform_indices = @transform_1, window_bounds = array<i64: 32, 128>}, {pipeline_mode = #tpu.pipeline_mode<synchronous>, transform_indices = @transform_2, window_bounds = array<i64: 1, 128>}, {pipeline_mode = #tpu.pipeline_mode<synchronous>, transform_indices = @transform_3, window_bounds = array<i64: 128, 128>}, {pipeline_mode = #tpu.pipeline_mode<synchronous>, transform_indices = @transform_4, window_bounds = array<i64: 1, 128>}, {pipeline_mode = #tpu.pipeline_mode<synchronous>, transform_indices = @transform_5, window_bounds = array<i64: 128, 8>}, {pipeline_mode = #tpu.pipeline_mode<synchronous>, transform_indices = @transform_6, window_bounds = array<i64: 1, 8>}, {transform_indices = @transform_7, window_bounds = array<i64: 8, 8>}]} {
    %c0 = arith.constant 0 : index
    %c0_0 = arith.constant 0 : index
    %0 = vector.load %arg1[%c0, %c0_0] : memref<8x32xf32, #tpu.memory_space<vmem>>, vector<8x32xf32>
    %c0_1 = arith.constant 0 : index
    %c0_2 = arith.constant 0 : index
    %1 = vector.load %arg2[%c0_1, %c0_2] : memref<32x128xf32, #tpu.memory_space<vmem>>, vector<32x128xf32>
    %c0_3 = arith.constant 0 : index
    %c0_4 = arith.constant 0 : index
    %2 = vector.load %arg3[%c0_3, %c0_4] : memref<1x128xf32, #tpu.memory_space<vmem>>, vector<1x128xf32>
    %cst = arith.constant dense<0.000000e+00> : vector<8x128xf32>
    %3 = tpu.matmul %0, %1, %cst {dimension_numbers = #tpu.dot_dimension_numbers<[1], [0], [0], [1], [0, 0, 1, 1], [], []>} : vector<8x32xf32>, vector<32x128xf32>, vector<8x128xf32> -> vector<8x128xf32>
    %4 = vector.broadcast %2 : vector<1x128xf32> to vector<8x128xf32>
    %5 = arith.addf %3, %4 : vector<8x128xf32>
    %cst_5 = arith.constant 0.000000e+00 : f32
    %6 = vector.broadcast %cst_5 : f32 to vector<8x128xf32>
    %7 = arith.maximumf %5, %6 : vector<8x128xf32>
    %c0_6 = arith.constant 0 : index
    %c0_7 = arith.constant 0 : index
    %8 = vector.load %arg4[%c0_6, %c0_7] : memref<128x128xf32, #tpu.memory_space<vmem>>, vector<128x128xf32>
    %c0_8 = arith.constant 0 : index
    %c0_9 = arith.constant 0 : index
    %9 = vector.load %arg5[%c0_8, %c0_9] : memref<1x128xf32, #tpu.memory_space<vmem>>, vector<1x128xf32>
    %cst_10 = arith.constant dense<0.000000e+00> : vector<8x128xf32>
    %10 = tpu.matmul %7, %8, %cst_10 {dimension_numbers = #tpu.dot_dimension_numbers<[1], [0], [0], [1], [0, 0, 1, 1], [], []>} : vector<8x128xf32>, vector<128x128xf32>, vector<8x128xf32> -> vector<8x128xf32>
    %11 = vector.broadcast %9 : vector<1x128xf32> to vector<8x128xf32>
    %12 = arith.addf %10, %11 : vector<8x128xf32>
    %cst_11 = arith.constant 0.000000e+00 : f32
    %13 = vector.broadcast %cst_11 : f32 to vector<8x128xf32>
    %14 = arith.maximumf %12, %13 : vector<8x128xf32>
    %c0_12 = arith.constant 0 : index
    %c0_13 = arith.constant 0 : index
    %15 = vector.load %arg6[%c0_12, %c0_13] : memref<128x8xf32, #tpu.memory_space<vmem>>, vector<128x8xf32>
    %c0_14 = arith.constant 0 : index
    %c0_15 = arith.constant 0 : index
    %16 = vector.load %arg7[%c0_14, %c0_15] : memref<1x8xf32, #tpu.memory_space<vmem>>, vector<1x8xf32>
    %cst_16 = arith.constant dense<0.000000e+00> : vector<8x8xf32>
    %17 = tpu.matmul %14, %15, %cst_16 {dimension_numbers = #tpu.dot_dimension_numbers<[1], [0], [0], [1], [0, 0, 1, 1], [], []>} : vector<8x128xf32>, vector<128x8xf32>, vector<8x8xf32> -> vector<8x8xf32>
    %18 = vector.broadcast %16 : vector<1x8xf32> to vector<8x8xf32>
    %19 = arith.addf %17, %18 : vector<8x8xf32>
    %c0_17 = arith.constant 0 : index
    %c0_18 = arith.constant 0 : index
    %20 = vector.load %arg8[%c0_17, %c0_18] : memref<8x8xf32, #tpu.memory_space<vmem>>, vector<8x8xf32>
    tpu.vector_store %arg8[%c0_17, %c0_18], %19 {strides = array<i32>} : memref<8x8xf32, #tpu.memory_space<vmem>>, vector<8x8xf32>,
    return
  }
  func.func @transform_0(%arg0: i32) -> (i32, i32) {
    %c0_i32 = arith.constant 0 : i32
    %c0_i32_0 = arith.constant 0 : i32
    return %arg0, %c0_i32 : i32, i32
  }
  func.func @transform_1(%arg0: i32) -> (i32, i32) {
    %c0_i32 = arith.constant 0 : i32
    %c0_i32_0 = arith.constant 0 : i32
    %c0_i32_1 = arith.constant 0 : i32
    return %c0_i32, %c0_i32_0 : i32, i32
  }
  func.func @transform_2(%arg0: i32) -> (i32, i32) {
    %c0_i32 = arith.constant 0 : i32
    %c0_i32_0 = arith.constant 0 : i32
    %c0_i32_1 = arith.constant 0 : i32
    return %c0_i32, %c0_i32_0 : i32, i32
  }
  func.func @transform_3(%arg0: i32) -> (i32, i32) {
    %c0_i32 = arith.constant 0 : i32
    %c0_i32_0 = arith.constant 0 : i32
    %c0_i32_1 = arith.constant 0 : i32
    return %c0_i32, %c0_i32_0 : i32, i32
  }
  func.func @transform_4(%arg0: i32) -> (i32, i32) {
    %c0_i32 = arith.constant 0 : i32
    %c0_i32_0 = arith.constant 0 : i32
    %c0_i32_1 = arith.constant 0 : i32
    return %c0_i32, %c0_i32_0 : i32, i32
  }
  func.func @transform_5(%arg0: i32) -> (i32, i32) {
    %c0_i32 = arith.constant 0 : i32
    %c0_i32_0 = arith.constant 0 : i32
    %c0_i32_1 = arith.constant 0 : i32
    return %c0_i32, %c0_i32_0 : i32, i32
  }
  func.func @transform_6(%arg0: i32) -> (i32, i32) {
    %c0_i32 = arith.constant 0 : i32
    %c0_i32_0 = arith.constant 0 : i32
    %c0_i32_1 = arith.constant 0 : i32
    return %c0_i32, %c0_i32_0 : i32, i32
  }
  func.func @transform_7(%arg0: i32) -> (i32, i32) {
    %c0_i32 = arith.constant 0 : i32
    %c0_i32_0 = arith.constant 0 : i32
    return %arg0, %c0_i32 : i32, i32
  }
}

</mosaic_0001>

<bundles_post_ra>
// kernel: tpu_custom_call.1
= control target key start
LH: loop header
LB: loop body
LE: loop exit
PB: predicated region body
PF: predicated region fallthrough
CT: control target
= control target key end

     0   :  { %12 = vsyncpa [#allocation3], 0  ;;  %s395_s0 = inlined_call_operand.vmem [shape: f32[8,32], index: 0, kind: input, shape index: {}]   ;;  %s396_s1 = inlined_call_operand.hbm [shape: f32[32,128], index: 1, kind: input, shape index: {}]   ;;  %s397_s2 = inlined_call_operand.vmem [shape: f32[1,128], index: 2, kind: input, shape index: {}]   ;;  %s398_s3 = inlined_call_operand.vmem [shape: f32[128,128], index: 3, kind: input, shape index: {}]   ;;  %s399_s4 = inlined_call_operand.vmem [shape: f32[1,128], index: 4, kind: input, shape index: {}]   ;;  %s400_s5 = inlined_call_operand.vmem [shape: f32[128,8], index: 5, kind: input, shape index: {}]   ;;  %s401_s6 = inlined_call_operand.vmem [shape: f32[1,8], index: 6, kind: input, shape index: {}]   ;;  %s402_s7 = inlined_call_operand.hbm [shape: f32[8,8], index: 7, kind: output, shape index: {}]  }
   0x1   :  { %13 = vsyncpa [#allocation4], 0  ;;  %s20_s26 = sshll.u32 %s396_s1, 4  ;;  %s237_s27 = smov [#allocation2]   ;;  %s21_s26 = int_to_ptr.hbm [resolvable:$true] %s20_s26 }
   0x2   :  { %s22_s28 = sshll.u32 %s237_s27, 4  ;;  %s238_s29 = smov 128   ;;  %s23_s28 = int_to_ptr.vmem [resolvable:$true] %s22_s28 }
   0x3   :  { %s239_s30 = smov 8  }
   0x4   :  { %28 = dma.hbm_to_vmem [thread:$0]  %s21_s26, 512, %s23_s28, [#allocation3], %s238_s29, %s238_s29, %s239_s30  }
   0x5   :  { %233 = dma.done.wait [#allocation3], 512  }
   0x6   :  { %234 = vsyncadd [#allocation3], 4294966784  ;;  %v47_v0 = vld [vmem:[#allocation2 + $0x18] sm:$0xff]  ;;  %v46_v1 = vld [vmem:[#allocation2 + $0x10] sm:$0xff]  ;;  %vm52_vm0 = vcmask 261120   ;;  %s240_s25 = smov [#allocation5]  }
   0x7   :  { %68 = vmatpush.msra.mxu0 %v47_v0  ;;  %v92_v2 = vld [vmem:[%s398_s3 + $0x78] sm:$0xff]  ;;  %v45_v3 = vld [vmem:[#allocation2 + $0x8] sm:$0xff]  ;;  %v91_v4 = vld [vmem:[%s398_s3 + $0x70] sm:$0xff]  ;;  %s165_s26 = sshll.u32 %s240_s25, 4  ;;  %s167_s29 = sshll.u32 %s402_s7, 4  ;;  %vm158_vm1 = vcmask 64512   ;;  %s166_s26 = int_to_ptr.vmem [resolvable:$true] %s165_s26  ;;  %s168_s29 = int_to_ptr.hbm [resolvable:$true] %s167_s29 }
   0x8   :  { %97 = vmatpush.msra.mxu1 %v92_v2  ;;  %v90_v5 = vld [vmem:[%s398_s3 + $0x68] sm:$0xff]  ;;  %v44_v6 = vld [vmem:[#allocation2] sm:$0xff]  ;;  %v88_v9 = vld [vmem:[%s398_s3 + $0x58] sm:$0xff] }
   0x9   :  { %69 = vmatpush.msra.mxu0 %v46_v1  ;;  %v43_v7 = vld [vmem:[%s395_s0] sm:$0xff]  ;;  %v87_v10 = vld [vmem:[%s398_s3 + $0x50] sm:$0xff]  ;;  %v86_v11 = vld [vmem:[%s398_s3 + $0x48] sm:$0xff] }
   0xa   :  { %98 = vmatpush.msra.mxu1 %v91_v4  ;;  %v89_v8 = vld [vmem:[%s398_s3 + $0x60] sm:$0xff]  ;;  %v84_v13 = vld [vmem:[%s398_s3 + $0x38] sm:$0xff]  ;;  %v83_v14 = vld [vmem:[%s398_s3 + $0x30] sm:$0xff] }
   0xb   :  { %70 = vmatpush.msra.mxu0 %v45_v3  ;;  %v85_v12 = vld [vmem:[%s398_s3 + $0x40] sm:$0xff]  ;;  %v82_v15 = vld [vmem:[%s398_s3 + $0x28] sm:$0xff]  ;;  %v80_v17 = vld [vmem:[%s398_s3 + $0x18] sm:$0xff] }
   0xc   :  { %99 = vmatpush.msra.mxu1 %v90_v5  ;;  %v81_v16 = vld [vmem:[%s398_s3 + $0x20] sm:$0xff]  ;;  %v79_v18 = vld [vmem:[%s398_s3 + $0x10] sm:$0xff]  ;;  %v78_v19 = vld [vmem:[%s398_s3 + $0x8] sm:$0xff] }
   0xd   :  { %71 = vmatpush.msra.mxu0 %v44_v6  ;;  %v77_v20 = vld [vmem:[%s398_s3] sm:$0xff]  ;;  %v133_v21 = vld [vmem:[%s400_s5 + $0x78] sm:$0xff]  ;;  %v132_v22 = vld [vmem:[%s400_s5 + $0x70] sm:$0xff] }
   0xe   :  { %177 = vmatmul.msk.f32.vlgmr.msra.gmra.mxu0 %vm52_vm0, %v43_v7  ;;  %100 = vmatpush.msra.mxu1 %v89_v8  ;;  %v131_v23 = vld [vmem:[%s400_s5 + $0x68] sm:$0xff]  ;;  %v130_v24 = vld [vmem:[%s400_s5 + $0x60] sm:$0xff]  ;;  %v129_v25 = vld [vmem:[%s400_s5 + $0x58] sm:$0xff] }
   0xf   :  { %138 = vmatpush.msra.mxu2 %v133_v21  ;;  %v128_v26 = vld [vmem:[%s400_s5 + $0x50] sm:$0xff]  ;;  %v127_v27 = vld [vmem:[%s400_s5 + $0x48] sm:$0xff]  ;;  %v126_v28 = vld [vmem:[%s400_s5 + $0x40] sm:$0xff] }
  0x10   :  { %101 = vmatpush.msra.mxu1 %v88_v9  ;;  %v125_v29 = vld [vmem:[%s400_s5 + $0x38] sm:$0xff]  ;;  %v124_v30 = vld [vmem:[%s400_s5 + $0x30] sm:$0xff]  ;;  %v123_v31 = vld [vmem:[%s400_s5 + $0x28] sm:$0xff] }
  0x11   :  { %139 = vmatpush.msra.mxu2 %v132_v22  ;;  %v122_v32 = vld [vmem:[%s400_s5 + $0x20] sm:$0xff]  ;;  %v121_v33 = vld [vmem:[%s400_s5 + $0x18] sm:$0xff]  ;;  %v120_v38 = vld [vmem:[%s400_s5 + $0x10] sm:$0xff] }
  0x12   :  { %102 = vmatpush.msra.mxu1 %v87_v10  ;;  %v182_v34 = vld [vmem:[%s397_s2] ss:$0 sm:$0xff]  ;;  %v119_v39 = vld [vmem:[%s400_s5 + $0x8] sm:$0xff] }
  0x13   :  { %140 = vmatpush.msra.mxu2 %v131_v23  ;;  %v118_v40 = vld [vmem:[%s400_s5] sm:$0xff] }
  0x14   :  { %103 = vmatpush.msra.mxu1 %v86_v11  ;;  %v183_v41 = vld [vmem:[%s399_s4] ss:$0 sm:$0xff] }
  0x15   :  { %141 = vmatpush.msra.mxu2 %v130_v24  ;;  %v184_v45 = vld [vmem:[%s401_s6] ss:$0 sm:$0xff] }
  0x16   :  { %104 = vmatpush.msra.mxu1 %v85_v12 }
  0x17   :  { %142 = vmatpush.msra.mxu2 %v129_v25 }
  0x18   :  { %105 = vmatpush.msra.mxu1 %v84_v13 }
  0x19   :  { %143 = vmatpush.msra.mxu2 %v128_v26 }
  0x1a   :  { %106 = vmatpush.msra.mxu1 %v83_v14 }
  0x1b   :  { %144 = vmatpush.msra.mxu2 %v127_v27 }
  0x1c   :  { %107 = vmatpush.msra.mxu1 %v82_v15 }
  0x1d   :  { %145 = vmatpush.msra.mxu2 %v126_v28 }
  0x1e   :  { %108 = vmatpush.msra.mxu1 %v81_v16 }
  0x1f   :  { %146 = vmatpush.msra.mxu2 %v125_v29 }
  0x20   :  { %109 = vmatpush.msra.mxu1 %v80_v17 }
  0x21   :  { %147 = vmatpush.msra.mxu2 %v124_v30 }
  0x22   :  { %110 = vmatpush.msra.mxu1 %v79_v18 }
  0x23   :  { %148 = vmatpush.msra.mxu2 %v123_v31 }
  0x24   :  { %111 = vmatpush.msra.mxu1 %v78_v19 }
  0x25   :  { %149 = vmatpush.msra.mxu2 %v122_v32 }
  0x26   :  { %112 = vmatpush.msra.mxu1 %v77_v20 }
  0x27   :  { %150 = vmatpush.msra.mxu2 %v121_v33 }
  0x29   :  { %151 = vmatpush.msra.mxu2 %v120_v38 }
  0x2b   :  { %152 = vmatpush.msra.mxu2 %v119_v39 }
  0x2d   :  { %153 = vmatpush.msra.mxu2 %v118_v40 }
  0x8b   :  { %v73_v35 = vpop.f32.mrf.mxu0 }
  0x8c   :  { %v74_v36 = vadd.f32 %v182_v34, %v73_v35 }
  0x8e   :  { %v76_v37 = vmax.f32 %v74_v36, 0.0 }
  0x90   :  { %113 = vmatmul.f32.vlgmr.msra.gmra.mxu1 %v76_v37 }
 0x10d   :  { %v114_v42 = vpop.f32.mrf.mxu1 }
 0x10e   :  { %v115_v43 = vadd.f32 %v183_v41, %v114_v42 }
 0x110   :  { %v117_v44 = vmax.f32 %v115_v43, 0.0 }
 0x112   :  { %154 = vmatmul.f32.vlgmr.msra.gmra.mxu2 %v117_v44 }
 0x195   :  { %v155_v46 = vpop.f32.mrf.mxu2 }
 0x196   :  { %v156_v47 = vadd.f32 %v184_v45, %v155_v46 }
 0x198   :  { %159 = vst.msk [vmem:[#allocation5] sm:$0xff] %vm158_vm1, %v156_v47 }
 0x199   :  { %170 = dma.vmem_to_hbm [thread:$0]  %s166_s26, 128, %s168_s29, [#allocation4]  }
 0x19a   :  { %235 = dma.done.wait [#allocation4], 128  }
 0x19b   :  { %236 = vsyncadd [#allocation4], 4294967168 }
 0x19c   :  { %175 = vsyncpa [#allocation3], 1 }
 0x19d   :  { %176 = vsyncpa [#allocation4], 1 }

</bundles_post_ra>
